<compile_context>
chip_gen: v5e
topology: v5e:2x2
jax: 0.10.0
libtpu: 0.0.40
codegen_flags: <defaults>
</compile_context>

<pallas_src>
import jax
import jax.numpy as jnp
from jax.experimental import pallas as pl
from jax.experimental.pallas import tpu as pltpu

HIDDEN1_DIM = 400
HIDDEN2_DIM = 100
NUM_CLASSES = 10  # `num_classes` is a free global in the PyTorch source; fixed here.

_LANE = 128           # lane width: last-dim padding target
_MIN_BATCH_TILE = 16  # sublane multiple safe for f32/bf16 tiles
_NEG_BIG = -1e30      # poison value for padded class lanes (exp underflows to 0)


def _round_up(n, m):
    return ((n + m - 1) // m) * m


def _mlp_kernel(x_ref, w1_ref, b1_ref, w2_ref, b2_ref, w3_ref, b3_ref, o_ref):
    # Cast the streamed f32 x tile to bf16 on the VPU (no wrapper HBM pass).
    x = x_ref[...].astype(w1_ref.dtype)

    # fc1 + ReLU  (bf16 operands, f32 accumulation on the MXU)
    h1 = jnp.dot(x, w1_ref[...], preferred_element_type=jnp.float32)
    h1 = jnp.maximum(h1 + b1_ref[...], 0.0)
    # fc2 + ReLU
    h2 = jnp.dot(h1.astype(w2_ref.dtype), w2_ref[...],
                 preferred_element_type=jnp.float32)
    h2 = jnp.maximum(h2 + b2_ref[...], 0.0)
    # fc3 — padded class lanes carry a -1e30 bias (w3 padded cols are zero), so
    # they are excluded from the softmax statistics with no per-tile masking.
    logits = jnp.dot(h2.astype(w3_ref.dtype), w3_ref[...],
                     preferred_element_type=jnp.float32)
    logits = logits + b3_ref[...]

    # Stable log_softmax over the class axis (PyTorch dim=1 == last axis here).
    m = jnp.max(logits, axis=-1, keepdims=True)
    z = logits - m
    lse = jnp.log(jnp.sum(jnp.exp(z), axis=-1, keepdims=True))
    o_ref[...] = (z - lse).astype(o_ref.dtype)


def perceptron_forward(x, params, *, block_batch=1024,
                       matmul_dtype=jnp.bfloat16, out_dtype=jnp.float32):
    """x: [B, input_dim] float32. params: dict of (w1,b1,w2,b2,w3,b3).

    out_dtype=jnp.bfloat16 halves the dominant padded-output writeback for
    small input_dim; the default stays f32 to match the PyTorch module.
    """
    B, input_dim = x.shape
    w1, b1 = params["w1"], params["b1"]
    w2, b2 = params["w2"], params["b2"]
    w3, b3 = params["w3"], params["b3"]
    assert w1.shape[0] == input_dim

    h1_dim, h2_dim, num_classes = w1.shape[1], w2.shape[1], w3.shape[1]

    # --- Lane-pad hidden/class dims (400->512, 100->128, 10->128). ---
    h1_p = _round_up(h1_dim, _LANE)
    h2_p = _round_up(h2_dim, _LANE)
    nc_p = _round_up(num_classes, _LANE)

    w1p = jnp.pad(w1, ((0, 0), (0, h1_p - h1_dim))).astype(matmul_dtype)
    b1p = jnp.pad(b1, (0, h1_p - h1_dim)).reshape(1, -1).astype(jnp.float32)
    w2p = jnp.pad(w2, ((0, h1_p - h1_dim), (0, h2_p - h2_dim))).astype(matmul_dtype)
    b2p = jnp.pad(b2, (0, h2_p - h2_dim)).reshape(1, -1).astype(jnp.float32)
    w3p = jnp.pad(w3, ((0, h2_p - h2_dim), (0, nc_p - num_classes))).astype(matmul_dtype)
    # Poison padded class lanes via the bias (one-time weight prep, not per tile).
    b3p = jnp.pad(b3.astype(jnp.float32), (0, nc_p - num_classes),
                  constant_values=_NEG_BIG).reshape(1, -1)

    # --- Batch tile: big enough to amortize per-step overhead, but capped at
    # ceil(B/2) when B is large so the v7x megacore gets >= 2 grid steps. ---
    if B >= 2 * _MIN_BATCH_TILE:
        half = _round_up(pl.cdiv(B, 2), _MIN_BATCH_TILE)
        bm = min(block_batch, half)
    else:
        bm = _round_up(B, _MIN_BATCH_TILE)
    bm = max(_MIN_BATCH_TILE, _round_up(bm, _MIN_BATCH_TILE))
    num_tiles = pl.cdiv(B, bm)   # ragged last block handled by Pallas masking

    # --- VMEM budget: estimate the tile footprint, clamp to 48 MiB (v7x-safe).
    # On v5e/v6e (128 MiB physical) this can be raised if block_batch grows. ---
    w_itemsize = jnp.dtype(matmul_dtype).itemsize
    out_itemsize = jnp.dtype(out_dtype).itemsize
    est = (2 * bm * input_dim * x.dtype.itemsize                       # x, double-buffered
           + 2 * bm * nc_p * out_itemsize                              # out, double-buffered
           + 2 * (input_dim * h1_p + h1_p * h2_p + h2_p * nc_p) * w_itemsize  # weights x2
           + 2 * (h1_p + h2_p + nc_p) * 4                              # biases x2
           + bm * (h1_p + h2_p + 2 * nc_p) * 4)                        # f32 intermediates
    vmem_limit = int(min(max(2 * est, 32 * 1024 * 1024), 48 * 1024 * 1024))

    def resident(arr):  # constant index_map -> stays in VMEM across grid steps
        return pl.BlockSpec(arr.shape, lambda i: (0, 0))

    out = pl.pallas_call(
        _mlp_kernel,
        out_shape=jax.ShapeDtypeStruct((B, nc_p), out_dtype),
        grid_spec=pltpu.PrefetchScalarGridSpec(
            num_scalar_prefetch=0,
            grid=(num_tiles,),
            in_specs=[
                pl.BlockSpec((bm, input_dim), lambda i: (i, 0)),  # streamed f32 x tile
                resident(w1p), resident(b1p),
                resident(w2p), resident(b2p),
                resident(w3p), resident(b3p),
            ],
            out_specs=pl.BlockSpec((bm, nc_p), lambda i: (i, 0)),
        ),
        compiler_params=pltpu.CompilerParams(
            dimension_semantics=("parallel",),
            vmem_limit_bytes=vmem_limit,
        ),
    )(x, w1p, b1p, w2p, b2p, w3p, b3p)

    # Strip the padded class lanes (lane-dense 128-wide store stays unmasked).
    return out[:, :num_classes]


def init_params(key, input_dim, num_classes):
    """Deterministic init mimicking nn.Linear's default U(-1/sqrt(fan_in), +)."""
    def linear(key, fan_in, fan_out):
        kw, kb = jax.random.split(key)
        bound = 1.0 / jnp.sqrt(fan_in)
        w = jax.random.uniform(kw, (fan_in, fan_out), jnp.float32, -bound, bound)
        b = jax.random.uniform(kb, (fan_out,), jnp.float32, -bound, bound)
        return w, b

    k1, k2, k3 = jax.random.split(key, 3)
    w1, b1 = linear(k1, input_dim, HIDDEN1_DIM)
    w2, b2 = linear(k2, HIDDEN1_DIM, HIDDEN2_DIM)
    w3, b3 = linear(k3, HIDDEN2_DIM, num_classes)
    return {"w1": w1, "b1": b1, "w2": w2, "b2": b2, "w3": w3, "b3": b3}


def reference_forward(x, p):
    h1 = jnp.maximum(x @ p["w1"] + p["b1"], 0.0)
    h2 = jnp.maximum(h1 @ p["w2"] + p["b2"], 0.0)
    logits = h2 @ p["w3"] + p["b3"]
    return jax.nn.log_softmax(logits, axis=1)


if __name__ == "__main__":
    key = jax.random.PRNGKey(0)
    kx, kp = jax.random.split(key)

    # --- small demo shape (single grid step, boundary-masked last block) ---
    batch, input_dim = 8, 32
    x = jax.random.normal(kx, (batch, input_dim), jnp.float32)
    params = init_params(kp, input_dim, NUM_CLASSES)

    out = jax.block_until_ready(perceptron_forward(x, params))
    ref = reference_forward(x, params)
    assert out.shape == (batch, NUM_CLASSES)
    assert jnp.allclose(out, ref, atol=5e-2, rtol=5e-2), "mismatch vs reference (small)"

    # --- multi-tile path: >=2 grid steps (megacore), ragged last block,
    #     MNIST-like non-128-multiple input_dim. ---
    kx2, kp2 = jax.random.split(jax.random.PRNGKey(1))
    batch2, input_dim2 = 100, 784
    x2 = jax.random.normal(kx2, (batch2, input_dim2), jnp.float32)
    params2 = init_params(kp2, input_dim2, NUM_CLASSES)

    out2 = jax.block_until_ready(perceptron_forward(x2, params2))
    ref2 = reference_forward(x2, params2)
    assert out2.shape == (batch2, NUM_CLASSES)
    assert jnp.allclose(out2, ref2, atol=5e-2, rtol=5e-2), "mismatch vs reference (tiled)"

    print("KERNEL_OK")
</pallas_src>

<mosaic_0001>
module attributes {stable_mosaic.version = 11 : i64} {
  func.func @_mlp_kernel(%arg0: i32, %arg1: memref<16x32xf32, #tpu.memory_space<vmem>>, %arg2: memref<32x512xbf16, #tpu.memory_space<vmem>>, %arg3: memref<1x512xf32, #tpu.memory_space<vmem>>, %arg4: memref<512x128xbf16, #tpu.memory_space<vmem>>, %arg5: memref<1x128xf32, #tpu.memory_space<vmem>>, %arg6: memref<128x128xbf16, #tpu.memory_space<vmem>>, %arg7: memref<1x128xf32, #tpu.memory_space<vmem>>, %arg8: memref<16x128xf32, #tpu.memory_space<vmem>>) attributes {dimension_semantics = [#tpu.dimension_semantics<parallel>], iteration_bounds = array<i64: 1>, scalar_prefetch = 0 : i64, scratch_operands = 0 : i64, tpu.core_type = #tpu.core_type<tc>, window_params = [{transform_indices = @transform_0, window_bounds = array<i64: 16, 32>}, {pipeline_mode = #tpu.pipeline_mode<synchronous>, transform_indices = @transform_1, window_bounds = array<i64: 32, 512>}, {pipeline_mode = #tpu.pipeline_mode<synchronous>, transform_indices = @transform_2, window_bounds = array<i64: 1, 512>}, {pipeline_mode = #tpu.pipeline_mode<synchronous>, transform_indices = @transform_3, window_bounds = array<i64: 512, 128>}, {pipeline_mode = #tpu.pipeline_mode<synchronous>, transform_indices = @transform_4, window_bounds = array<i64: 1, 128>}, {pipeline_mode = #tpu.pipeline_mode<synchronous>, transform_indices = @transform_5, window_bounds = array<i64: 128, 128>}, {pipeline_mode = #tpu.pipeline_mode<synchronous>, transform_indices = @transform_6, window_bounds = array<i64: 1, 128>}, {transform_indices = @transform_7, window_bounds = array<i64: 16, 128>}]} {
    %c0 = arith.constant 0 : index
    %c0_0 = arith.constant 0 : index
    %0 = vector.load %arg1[%c0, %c0_0] : memref<16x32xf32, #tpu.memory_space<vmem>>, vector<16x32xf32>
    %1 = arith.truncf %0 : vector<16x32xf32> to vector<16x32xbf16>
    %c0_1 = arith.constant 0 : index
    %c0_2 = arith.constant 0 : index
    %2 = vector.load %arg2[%c0_1, %c0_2] : memref<32x512xbf16, #tpu.memory_space<vmem>>, vector<32x512xbf16>
    %cst = arith.constant dense<0.000000e+00> : vector<16x512xf32>
    %3 = tpu.matmul %1, %2, %cst {dimension_numbers = #tpu.dot_dimension_numbers<[1], [0], [0], [1], [0, 0, 1, 1], [], []>} : vector<16x32xbf16>, vector<32x512xbf16>, vector<16x512xf32> -> vector<16x512xf32>
    %c0_3 = arith.constant 0 : index
    %c0_4 = arith.constant 0 : index
    %4 = vector.load %arg3[%c0_3, %c0_4] : memref<1x512xf32, #tpu.memory_space<vmem>>, vector<1x512xf32>
    %5 = vector.broadcast %4 : vector<1x512xf32> to vector<16x512xf32>
    %6 = arith.addf %3, %5 : vector<16x512xf32>
    %cst_5 = arith.constant 0.000000e+00 : f32
    %7 = vector.broadcast %cst_5 : f32 to vector<16x512xf32>
    %8 = arith.maximumf %6, %7 : vector<16x512xf32>
    %9 = arith.truncf %8 : vector<16x512xf32> to vector<16x512xbf16>
    %c0_6 = arith.constant 0 : index
    %c0_7 = arith.constant 0 : index
    %10 = vector.load %arg4[%c0_6, %c0_7] : memref<512x128xbf16, #tpu.memory_space<vmem>>, vector<512x128xbf16>
    %cst_8 = arith.constant dense<0.000000e+00> : vector<16x128xf32>
    %11 = tpu.matmul %9, %10, %cst_8 {dimension_numbers = #tpu.dot_dimension_numbers<[1], [0], [0], [1], [0, 0, 1, 1], [], []>} : vector<16x512xbf16>, vector<512x128xbf16>, vector<16x128xf32> -> vector<16x128xf32>
    %c0_9 = arith.constant 0 : index
    %c0_10 = arith.constant 0 : index
    %12 = vector.load %arg5[%c0_9, %c0_10] : memref<1x128xf32, #tpu.memory_space<vmem>>, vector<1x128xf32>
    %13 = vector.broadcast %12 : vector<1x128xf32> to vector<16x128xf32>
    %14 = arith.addf %11, %13 : vector<16x128xf32>
    %cst_11 = arith.constant 0.000000e+00 : f32
    %15 = vector.broadcast %cst_11 : f32 to vector<16x128xf32>
    %16 = arith.maximumf %14, %15 : vector<16x128xf32>
    %17 = arith.truncf %16 : vector<16x128xf32> to vector<16x128xbf16>
    %c0_12 = arith.constant 0 : index
    %c0_13 = arith.constant 0 : index
    %18 = vector.load %arg6[%c0_12, %c0_13] : memref<128x128xbf16, #tpu.memory_space<vmem>>, vector<128x128xbf16>
    %cst_14 = arith.constant dense<0.000000e+00> : vector<16x128xf32>
    %19 = tpu.matmul %17, %18, %cst_14 {dimension_numbers = #tpu.dot_dimension_numbers<[1], [0], [0], [1], [0, 0, 1, 1], [], []>} : vector<16x128xbf16>, vector<128x128xbf16>, vector<16x128xf32> -> vector<16x128xf32>
    %c0_15 = arith.constant 0 : index
    %c0_16 = arith.constant 0 : index
    %20 = vector.load %arg7[%c0_15, %c0_16] : memref<1x128xf32, #tpu.memory_space<vmem>>, vector<1x128xf32>
    %21 = vector.broadcast %20 : vector<1x128xf32> to vector<16x128xf32>
    %22 = arith.addf %19, %21 : vector<16x128xf32>
    %cst_17 = arith.constant dense<0xFF800000> : vector<16xf32>
    %23 = vector.multi_reduction <maximumf>, %22, %cst_17 [1] : vector<16x128xf32> to vector<16xf32>
    %24 = vector.shape_cast %23 : vector<16xf32> to vector<16x1xf32>
    %25 = vector.broadcast %24 : vector<16x1xf32> to vector<16x128xf32>
    %26 = arith.subf %22, %25 : vector<16x128xf32>
    %27 = math.exp %26 : vector<16x128xf32>
    %cst_18 = arith.constant dense<0.000000e+00> : vector<16xf32>
    %28 = vector.multi_reduction <add>, %27, %cst_18 [1] : vector<16x128xf32> to vector<16xf32>
    %29 = vector.shape_cast %28 : vector<16xf32> to vector<16x1xf32>
    %30 = math.log %29 : vector<16x1xf32>
    %31 = vector.broadcast %30 : vector<16x1xf32> to vector<16x128xf32>
    %32 = arith.subf %26, %31 : vector<16x128xf32>
    %c0_19 = arith.constant 0 : index
    %c0_20 = arith.constant 0 : index
    %33 = vector.load %arg8[%c0_19, %c0_20] : memref<16x128xf32, #tpu.memory_space<vmem>>, vector<16x128xf32>
    tpu.vector_store %arg8[%c0_19, %c0_20], %32 {strides = array<i32>} : memref<16x128xf32, #tpu.memory_space<vmem>>, vector<16x128xf32>,
    return
  }
  func.func @transform_0(%arg0: i32) -> (i32, i32) {
    %c0_i32 = arith.constant 0 : i32
    %c0_i32_0 = arith.constant 0 : i32
    return %arg0, %c0_i32 : i32, i32
  }
  func.func @transform_1(%arg0: i32) -> (i32, i32) {
    %c0_i32 = arith.constant 0 : i32
    %c0_i32_0 = arith.constant 0 : i32
    %c0_i32_1 = arith.constant 0 : i32
    return %c0_i32, %c0_i32_0 : i32, i32
  }
  func.func @transform_2(%arg0: i32) -> (i32, i32) {
    %c0_i32 = arith.constant 0 : i32
    %c0_i32_0 = arith.constant 0 : i32
    %c0_i32_1 = arith.constant 0 : i32
    return %c0_i32, %c0_i32_0 : i32, i32
  }
  func.func @transform_3(%arg0: i32) -> (i32, i32) {
    %c0_i32 = arith.constant 0 : i32
    %c0_i32_0 = arith.constant 0 : i32
    %c0_i32_1 = arith.constant 0 : i32
    return %c0_i32, %c0_i32_0 : i32, i32
  }
  func.func @transform_4(%arg0: i32) -> (i32, i32) {
    %c0_i32 = arith.constant 0 : i32
    %c0_i32_0 = arith.constant 0 : i32
    %c0_i32_1 = arith.constant 0 : i32
    return %c0_i32, %c0_i32_0 : i32, i32
  }
  func.func @transform_5(%arg0: i32) -> (i32, i32) {
    %c0_i32 = arith.constant 0 : i32
    %c0_i32_0 = arith.constant 0 : i32
    %c0_i32_1 = arith.constant 0 : i32
    return %c0_i32, %c0_i32_0 : i32, i32
  }
  func.func @transform_6(%arg0: i32) -> (i32, i32) {
    %c0_i32 = arith.constant 0 : i32
    %c0_i32_0 = arith.constant 0 : i32
    %c0_i32_1 = arith.constant 0 : i32
    return %c0_i32, %c0_i32_0 : i32, i32
  }
  func.func @transform_7(%arg0: i32) -> (i32, i32) {
    %c0_i32 = arith.constant 0 : i32
    %c0_i32_0 = arith.constant 0 : i32
    return %arg0, %c0_i32 : i32, i32
  }
}

</mosaic_0001>

<bundles_post_ra>
// kernel: tpu_custom_call.1
= control target key start
LH: loop header
LB: loop body
LE: loop exit
PB: predicated region body
PF: predicated region fallthrough
CT: control target
= control target key end

     0   :  { %12 = vsyncpa [#allocation3], 0  ;;  %s1185_s0 = inlined_call_operand.hbm [shape: f32[8,32], index: 0, kind: input, shape index: {}]   ;;  %s1186_s1 = inlined_call_operand.hbm [shape: bf16[32,512], index: 1, kind: input, shape index: {}]   ;;  %s1187_s2 = inlined_call_operand.hbm [shape: f32[1,512], index: 2, kind: input, shape index: {}]   ;;  %s1188_s3 = inlined_call_operand.hbm [shape: bf16[512,128], index: 3, kind: input, shape index: {}]   ;;  %s1189_s4 = inlined_call_operand.vmem [shape: f32[1,128], index: 4, kind: input, shape index: {}]   ;;  %s1190_s5 = inlined_call_operand.hbm [shape: bf16[128,128], index: 5, kind: input, shape index: {}]   ;;  %s1191_s6 = inlined_call_operand.vmem [shape: f32[1,128], index: 6, kind: input, shape index: {}]   ;;  %s1192_s7 = inlined_call_operand.hbm [shape: f32[8,128], index: 7, kind: output, shape index: {}]  }
   0x1   :  { %13 = vsyncpa [#allocation6], 0 }
   0x2   :  { %14 = vsyncpa [#allocation9], 0 }
   0x3   :  { %15 = vsyncpa [#allocation4], 0  ;;  %s33_s26 = sshll.u32 %s1186_s1, 4  ;;  %s34_s26 = int_to_ptr.hbm [resolvable:$true] %s33_s26 }
   0x4   :  { %19 = vsyncadd [#allocation3], 128  ;;  %s1099_s27 = smov [#allocation5]   ;;  %s57_s8 = sshll.u32 %s1188_s3, 4  ;;  %s58_s8 = int_to_ptr.hbm [resolvable:$true] %s57_s8 }
   0x5   :  { %s35_s28 = sshll.u32 %s1099_s27, 4  ;;  %s1100_s9 = smov 256   ;;  %s36_s28 = int_to_ptr.vmem [resolvable:$true] %s35_s28 }
   0x6   :  { %s1101_s10 = smov 16   ;;  %s1102_s11 = smov [#allocation8]  }
   0x7   :  { %41 = dma.hbm_to_vmem [thread:$0]  %s34_s26, 1024, %s36_s28, [#allocation6], %s1100_s9, %s1100_s9, %s1101_s10  }
   0x8   :  { %s59_s12 = sshll.u32 %s1102_s11, 4  ;;  %s1103_s13 = smov 64   ;;  %s60_s12 = int_to_ptr.vmem [resolvable:$true] %s59_s12 }
   0x9   :  { %s1104_s14 = smov 4   ;;  %s20_s16 = sshll.u32 %s1185_s0, 4  ;;  %s21_s16 = int_to_ptr.hbm [resolvable:$true] %s20_s16 }
   0xa   :  { %65 = dma.hbm_to_vmem [thread:$0]  %s58_s8, 4096, %s60_s12, [#allocation9], %s1103_s13, %s1103_s13, %s1104_s14  }
   0xb   :  { %s1105_s17 = smov [#allocation2]   ;;  %s47_s20 = sshll.u32 %s1187_s2, 4  ;;  %s48_s20 = int_to_ptr.hbm [resolvable:$true] %s47_s20 }
   0xc   :  { %s22_s18 = sshll.u32 %s1105_s17, 4  ;;  %s1106_s21 = smov 128   ;;  %s23_s18 = int_to_ptr.vmem [resolvable:$true] %s22_s18 }
   0xd   :  { %s1107_s22 = smov 8   ;;  %s1108_s23 = smov [#allocation7]  }
   0xe   :  { %28 = dma.hbm_to_vmem [thread:$0]  %s21_s16, 128, %s23_s18, [#allocation3], %s1106_s21, %s1106_s21, %s1107_s22  }
   0xf   :  { %s49_s24 = sshll.u32 %s1108_s23, 4  ;;  %s72_s0 = sshll.u32 %s1190_s5, 4  ;;  %s50_s24 = int_to_ptr.vmem [resolvable:$true] %s49_s24  ;;  %s73_s0 = int_to_ptr.hbm [resolvable:$true] %s72_s0 }
  0x10   :  { %52 = dma.hbm_to_vmem [thread:$0]  %s48_s20, 64, %s50_s24, [#allocation6]  }
  0x11   :  { %s1109_s27 = smov [#allocation10]  }
  0x12   :  { %s74_s28 = sshll.u32 %s1109_s27, 4  ;;  %s75_s28 = int_to_ptr.vmem [resolvable:$true] %s74_s28 }
  0x13   :  { %80 = dma.hbm_to_vmem [thread:$0]  %s73_s0, 1024, %s75_s28, [#allocation9], %s1103_s13, %s1103_s13, %s1104_s14  }
  0x14   :  { %1091 = dma.done.wait [#allocation3], 256  }
  0x15   :  { %1092 = vsyncadd [#allocation3], 4294967040 }
  0x16   :  { %1093 = dma.done.wait [#allocation6], 1088  }
  0x17   :  { %1094 = vsyncadd [#allocation6], 4294966208 }
  0x18   :  { %1095 = dma.done.wait [#allocation9], 5120  }
  0x19   :  { %1096 = vsyncadd [#allocation9], 4294962176  ;;  %v699_v0 = vld [vmem:[#allocation5 + $0x20] sm:$0xf]  ;;  %v883_v1 = vld [vmem:[#allocation5 + $0x2c] sm:$0xf0] }
  0x1a   :  { %v707_v2 = vld [vmem:[#allocation5 + $0x28] sm:$0xf]  ;;  %v700_v3 = vor.u32 %v883_v1, %v699_v0  ;;  %v884_v4 = vld [vmem:[#allocation5 + $0x34] sm:$0xf0]  ;;  %v882_v5 = vld [vmem:[#allocation5 + $0x2c] sm:$0xf] }
  0x1b   :  { %v709_v6 = vld [vmem:[#allocation5 + $0x38] sm:$0xf0]  ;;  %v708_v7 = vor.u32 %v884_v4, %v707_v2  ;;  %v683_v9 = vld [vmem:[#allocation5] sm:$0xf]  ;;  %v879_v10 = vld [vmem:[#allocation5 + $0xc] sm:$0xf0] }
  0x1c   :  { %v712_v8 = vor.u32 %v882_v5, %v709_v6  ;;  %v691_v11 = vld [vmem:[#allocation5 + $0x8] sm:$0xf]  ;;  %175 = vmatpush.bf16.msra.mxu1 %v700_v3  ;;  %v684_v12 = vor.u32 %v879_v10, %v683_v9  ;;  %v880_v13 = vld [vmem:[#allocation5 + $0x14] sm:$0xf0]  ;;  %v878_v14 = vld [vmem:[#allocation5 + $0xc] sm:$0xf] }
  0x1d   :  { %v693_v15 = vld [vmem:[#allocation5 + $0x18] sm:$0xf0]  ;;  %203 = vmatpush.bf16.msra.mxu2 %v708_v7  ;;  %v692_v16 = vor.u32 %v880_v13, %v691_v11  ;;  %v104_v18 = vld [vmem:[#allocation2] sm:$0xff]  ;;  %v881_v20 = vld [vmem:[#allocation5 + $0x24] sm:$0xf]  ;;  %vm165_vm0 = vcmask 261120  }
  0x1e   :  { %217 = vmatpush.bf16.msra.mxu3 %v712_v8  ;;  %v696_v17 = vor.u32 %v878_v14, %v693_v15  ;;  %v105_v19 = vld [vmem:[#allocation2 + $0x8] sm:$0xff]  ;;  %v701_v21 = vld [vmem:[#allocation5 + $0x30] sm:$0xf0]  ;;  %v877_v22 = vld [vmem:[#allocation5 + $0x4] sm:$0xf] }
  0x1f   :  { %v106_v23 = vpack.c.bf16 %v105_v19, %v104_v18  ;;  %v704_v24 = vor.u32 %v881_v20, %v701_v21  ;;  %v685_v25 = vld [vmem:[#allocation5 + $0x10] sm:$0xf0]  ;;  %v892_v26 = vld [vmem:[#allocation8 + $0x38] sm:$0xff]  ;;  %v890_v33 = vld [vmem:[#allocation8 + $0x28] sm:$0xff] }
  0x20   :  { %v908_v27 = vld [vmem:[#allocation8 + $0xb8] sm:$0xff]  ;;  %176 = vmatpush.bf16.msra.mxu1 %v684_v12  ;;  %v688_v29 = vor.u32 %v877_v22, %v685_v25  ;;  %497 = vmatpush.bf16.msra.mxu0 %v892_v26  ;;  %v891_v30 = vld [vmem:[#allocation8 + $0x30] sm:$0xff]  ;;  %v906_v34 = vld [vmem:[#allocation8 + $0xa8] sm:$0xff] }
  0x21   :  { %204 = vmatpush.bf16.msra.mxu2 %v692_v16  ;;  %v916_v28 = vld [vmem:[#allocation8 + $0xf8] sm:$0xff]  ;;  %v907_v31 = vld [vmem:[#allocation8 + $0xb0] sm:$0xff]  ;;  %v914_v35 = vld [vmem:[#allocation8 + $0xe8] sm:$0xff] }
  0x22   :  { %218 = vmatpush.bf16.msra.mxu3 %v696_v17  ;;  %v915_v32 = vld [vmem:[#allocation8 + $0xf0] sm:$0xff]  ;;  %v889_v36 = vld [vmem:[#allocation8 + $0x20] sm:$0xff]  ;;  %v888_v37 = vld [vmem:[#allocation8 + $0x18] sm:$0xff] }
  0x23   :  { %713 = vmatmul.msk.bf16.vlgmr.msra.gmra.mxu1 %vm165_vm0, %v106_v23  ;;  %v900_v38 = vld [vmem:[#allocation8 + $0x78] sm:$0xff]  ;;  %v905_v39 = vld [vmem:[#allocation8 + $0xa0] sm:$0xff]  ;;  %v887_v41 = vld [vmem:[#allocation8 + $0x10] sm:$0xff] }
  0x24   :  { %189 = vmatpush.bf16.msrb.mxu1 %v704_v24  ;;  %715 = vmatmul.msk.bf16.vlgmr.msra.gmra.mxu2 %vm165_vm0, %v106_v23  ;;  %v913_v40 = vld [vmem:[#allocation8 + $0xe0] sm:$0xff]  ;;  %v899_v42 = vld [vmem:[#allocation8 + $0x70] sm:$0xff]  ;;  %v904_v43 = vld [vmem:[#allocation8 + $0x98] sm:$0xff] }
  0x25   :  { %525 = vmatpush.bf16.msrb.mxu2 %v908_v27  ;;  %716 = vmatmul.msk.bf16.vlgmr.msra.gmra.mxu3 %vm165_vm0, %v106_v23  ;;  %v912_v44 = vld [vmem:[#allocation8 + $0xd8] sm:$0xff]  ;;  %v886_v45 = vld [vmem:[#allocation8 + $0x8] sm:$0xff]  ;;  %v903_v47 = vld [vmem:[#allocation8 + $0x90] sm:$0xff] }
  0x26   :  { %539 = vmatpush.bf16.msrb.mxu3 %v916_v28  ;;  %498 = vmatpush.bf16.msra.mxu0 %v891_v30  ;;  %v898_v46 = vld [vmem:[#allocation8 + $0x68] sm:$0xff]  ;;  %v911_v48 = vld [vmem:[#allocation8 + $0xd0] sm:$0xff]  ;;  %v885_v49 = vld [vmem:[#allocation8] sm:$0xff] }
  0x27   :  { %v897_v50 = vld [vmem:[#allocation8 + $0x60] sm:$0xff]  ;;  %v902_v51 = vld [vmem:[#allocation8 + $0x88] sm:$0xff]  ;;  %v896_v53 = vld [vmem:[#allocation8 + $0x58] sm:$0xff] }
  0x28   :  { %190 = vmatpush.bf16.msrb.mxu1 %v688_v29  ;;  %v910_v52 = vld [vmem:[#allocation8 + $0xc8] sm:$0xff]  ;;  %v901_v54 = vld [vmem:[#allocation8 + $0x80] sm:$0xff]  ;;  %v895_v56 = vld [vmem:[#allocation8 + $0x50] sm:$0xff] }
  0x29   :  { %526 = vmatpush.bf16.msrb.mxu2 %v907_v31  ;;  %v909_v55 = vld [vmem:[#allocation8 + $0xc0] sm:$0xff]  ;;  %v894_v57 = vld [vmem:[#allocation8 + $0x48] sm:$0xff]  ;;  %v115_v59 = vld [vmem:[#allocation7] sm:$0xf] }
  0x2a   :  { %540 = vmatpush.bf16.msrb.mxu3 %v915_v32  ;;  %499 = vmatpush.bf16.msra.mxu0 %v890_v33  ;;  %v893_v58 = vld [vmem:[#allocation8 + $0x40] sm:$0xff]  ;;  %v117_v61 = vperm.slane %v115_v59, 0  ;;  %v120_v1 = vperm.slane %v115_v59, 3  ;;  %v119_v4 = vperm.slane %v115_v59, 2  ;;  %v118_v19 = vperm.slane %v115_v59, 1  ;;  %v924_v28 = vld [vmem:[#allocation10 + $0x38] sm:$0xff] }
  0x2b   :  { %v923_v29 = vld [vmem:[#allocation10 + $0x30] sm:$0xff]  ;;  %v922_v30 = vld [vmem:[#allocation10 + $0x28] sm:$0xff]  ;;  %v921_v31 = vld [vmem:[#allocation10 + $0x20] sm:$0xff] }
  0x2c   :  { %511 = vmatpush.bf16.msra.mxu1 %v900_v38  ;;  %v920_v32 = vld [vmem:[#allocation10 + $0x18] sm:$0xff]  ;;  %v919_v33 = vld [vmem:[#allocation10 + $0x10] sm:$0xff] }
  0x2d   :  { %527 = vmatpush.bf16.msrb.mxu2 %v906_v34  ;;  %v918_v34 = vld [vmem:[#allocation10 + $0x8] sm:$0xff] }
  0x2e   :  { %541 = vmatpush.bf16.msrb.mxu3 %v914_v35  ;;  %500 = vmatpush.bf16.msra.mxu0 %v889_v36  ;;  %v917_v35 = vld [vmem:[#allocation10] sm:$0xff] }
  0x30   :  { %512 = vmatpush.bf16.msra.mxu1 %v899_v42 }
  0x31   :  { %528 = vmatpush.bf16.msrb.mxu2 %v905_v39 }
  0x32   :  { %501 = vmatpush.bf16.msra.mxu0 %v888_v37  ;;  %542 = vmatpush.bf16.msrb.mxu3 %v913_v40  ;;  %v937_v37 = vld [vmem:[%s1189_s4] ss:$0 sm:$0xff] }
  0x33   :  { %714 = vmatmul.msk.bf16.vlgmr.msrb.gmra.mxu1 %vm165_vm0, %v106_v23 }
  0x34   :  { %513 = vmatpush.bf16.msra.mxu1 %v898_v46 }
  0x35   :  { %529 = vmatpush.bf16.msrb.mxu2 %v904_v43 }
  0x36   :  { %502 = vmatpush.bf16.msra.mxu0 %v887_v41  ;;  %543 = vmatpush.bf16.msrb.mxu3 %v912_v44 }
  0x38   :  { %514 = vmatpush.bf16.msra.mxu1 %v897_v50 }
  0x39   :  { %530 = vmatpush.bf16.msrb.mxu2 %v903_v47 }
  0x3a   :  { %503 = vmatpush.bf16.msra.mxu0 %v886_v45  ;;  %544 = vmatpush.bf16.msrb.mxu3 %v911_v48 }
  0x3c   :  { %515 = vmatpush.bf16.msra.mxu1 %v896_v53 }
  0x3d   :  { %531 = vmatpush.bf16.msrb.mxu2 %v902_v51 }
  0x3e   :  { %504 = vmatpush.bf16.msra.mxu0 %v885_v49  ;;  %545 = vmatpush.bf16.msrb.mxu3 %v910_v52 }
  0x40   :  { %516 = vmatpush.bf16.msra.mxu1 %v895_v56  ;;  %v938_v56 = vld [vmem:[%s1191_s6] ss:$0 sm:$0xff] }
  0x41   :  { %532 = vmatpush.bf16.msrb.mxu2 %v901_v54 }
  0x42   :  { %546 = vmatpush.bf16.msrb.mxu3 %v909_v55  ;;  %624 = vmatpush.bf16.msrb.mxu0 %v924_v28 }
  0x44   :  { %517 = vmatpush.bf16.msra.mxu1 %v894_v57 }
  0x46   :  { %625 = vmatpush.bf16.msrb.mxu0 %v923_v29 }
  0x48   :  { %518 = vmatpush.bf16.msra.mxu1 %v893_v58 }
  0x4a   :  { %626 = vmatpush.bf16.msrb.mxu0 %v922_v30 }
  0x4e   :  { %627 = vmatpush.bf16.msrb.mxu0 %v921_v31 }
  0x52   :  { %628 = vmatpush.bf16.msrb.mxu0 %v920_v32 }
  0x56   :  { %629 = vmatpush.bf16.msrb.mxu0 %v919_v33 }
  0x5a   :  { %630 = vmatpush.bf16.msrb.mxu0 %v918_v34 }
  0x5e   :  { %631 = vmatpush.bf16.msrb.mxu0 %v917_v35 }
  0xa0   :  { %v178_v60 = vpop.f32.mrf.mxu1 }
  0xa1   :  { %v179_v62 = vadd.f32 %v178_v60, %v117_v61 }
  0xa3   :  { %v225_v5 = vmax.f32 %v179_v62, 0.0 }
  0xa7   :  { %v206_v63 = vpop.f32.mrf.mxu2 }
  0xa8   :  { %v220_v0 = vpop.f32.mrf.mxu3  ;;  %v180_v2 = vpop.f32.mrf.mxu1  ;;  %v207_v9 = vadd.f32 %v206_v63, %v119_v4 }
  0xa9   :  { %v181_v3 = vadd.f32 %v180_v2, %v117_v61  ;;  %v221_v7 = vadd.f32 %v220_v0, %v120_v1 }
  0xaa   :  { %v227_v16 = vmax.f32 %v207_v9, 0.0 }
  0xab   :  { %v229_v6 = vmax.f32 %v181_v3, 0.0  ;;  %v228_v12 = vmax.f32 %v221_v7, 0.0 }
  0xad   :  { %v233_v8 = vpack.c.bf16 %v229_v6, %v225_v5 }
  0xaf   :  { %v208_v10 = vpop.f32.mrf.mxu2  ;;  %505 = vmatmul.bf16.vlgmr.msra.gmra.mxu0 %v233_v8 }
  0xb0   :  { %v222_v11 = vpop.f32.mrf.mxu3  ;;  %v209_v13 = vadd.f32 %v208_v10, %v119_v4  ;;  %v192_v15 = vpop.f32.mrf.mxu1 }
  0xb1   :  { %v223_v14 = vadd.f32 %v222_v11, %v120_v1  ;;  %v193_v22 = vadd.f32 %v192_v15, %v118_v19 }
  0xb2   :  { %v231_v17 = vmax.f32 %v209_v13, 0.0 }
  0xb3   :  { %v232_v18 = vmax.f32 %v223_v14, 0.0  ;;  %v226_v25 = vmax.f32 %v193_v22, 0.0 }
  0xb4   :  { %v235_v20 = vpack.c.bf16 %v231_v17, %v227_v16 }
  0xb5   :  { %v236_v21 = vpack.c.bf16 %v232_v18, %v228_v12 }
  0xb6   :  { %533 = vmatmul.bf16.vlgmr.msrb.gmra.mxu2 %v235_v20 }
  0xb7   :  { %547 = vmatmul.bf16.vlgmr.msrb.gmra.mxu3 %v236_v21 }
  0xb8   :  { %v194_v23 = vpop.f32.mrf.mxu1 }
  0xb9   :  { %v195_v24 = vadd.f32 %v194_v23, %v118_v19 }
  0xbb   :  { %v230_v26 = vmax.f32 %v195_v24, 0.0 }
  0xbd   :  { %v234_v27 = vpack.c.bf16 %v230_v26, %v226_v25 }
  0xbf   :  { %519 = vmatmul.bf16.vlgmr.msra.gmra.mxu1 %v234_v27 }
 0x12c   :  { %v506_v36 = vpop.f32.mrf.mxu0 }
 0x12d   :  { %v507_v40 = vadd.f32 %v937_v37, %v506_v36 }
 0x134   :  { %v508_v43 = vpop.f32.mrf.mxu0 }
 0x135   :  { %v509_v44 = vadd.f32 %v937_v37, %v508_v43 }
 0x139   :  { %v534_v38 = vpop.f32.mrf.mxu2 }
 0x13a   :  { %v548_v41 = vpop.f32.mrf.mxu3 }
 0x13c   :  { %v520_v39 = vpop.f32.mrf.mxu1 }
 0x13d   :  { %v521_v42 = vadd.f32 %v520_v39, %v507_v40 }
 0x13f   :  { %v535_v45 = vadd.f32 %v534_v38, %v521_v42 }
 0x141   :  { %v536_v48 = vpop.f32.mrf.mxu2  ;;  %v549_v49 = vadd.f32 %v548_v41, %v535_v45 }
 0x142   :  { %v550_v51 = vpop.f32.mrf.mxu3 }
 0x143   :  { %v553_v53 = vmax.f32 %v549_v49, 0.0 }
 0x144   :  { %v522_v46 = vpop.f32.mrf.mxu1 }
 0x145   :  { %v523_v47 = vadd.f32 %v522_v46, %v509_v44 }
 0x147   :  { %v537_v50 = vadd.f32 %v536_v48, %v523_v47 }
 0x149   :  { %v551_v52 = vadd.f32 %v550_v51, %v537_v50 }
 0x14b   :  { %v554_v54 = vmax.f32 %v551_v52, 0.0 }
 0x14d   :  { %v555_v55 = vpack.c.bf16 %v554_v54, %v553_v53 }
 0x14f   :  { %632 = vmatmul.bf16.vlgmr.msrb.gmra.mxu0 %v555_v55 }
 0x1cc   :  { %v633_v57 = vpop.f32.mrf.mxu0 }
 0x1cd   :  { %v634_v58 = vadd.f32 %v938_v56, %v633_v57 }
 0x1cf   :  { %638 = vmax.xlane.f32.xlu0 %v634_v58 }
 0x1d4   :  { %v635_v59 = vpop.f32.mrf.mxu0 }
 0x1d5   :  { %v636_v60 = vadd.f32 %v938_v56, %v635_v59 }
 0x1d7   :  { %640 = vmax.xlane.f32.xlu0 %v636_v60 }
 0x242   :  { %v639_v61 = vpop.xlane.xlu0 %638 }
 0x243   :  { %v642_v62 = vsub.f32 %v634_v58, %v639_v61 }
 0x245   :  { %v644_v63 = vmul.f32 1.442695, %v642_v62 }
 0x247   :  { %939 = vpow2.f32 %v644_v63 }
 0x24a   :  { %v641_v0 = vpop.xlane.xlu0 %640 }
 0x24b   :  { %v643_v1 = vsub.f32 %v636_v60, %v641_v0 }
 0x24d   :  { %v940_v2 = vpop.eup %939  ;;  %v646_v3 = vmul.f32 1.442695, %v643_v1 }
 0x24e   :  { %648 = vadd.xlane.f32.xlu1 %v940_v2 }
 0x24f   :  { %941 = vpow2.f32 %v646_v3 }
 0x255   :  { %v942_v4 = vpop.eup %941 }
 0x256   :  { %650 = vadd.xlane.f32.xlu1 %v942_v4 }
 0x2c1   :  { %v649_v5 = vpop.xlane.xlu1 %648 }
 0x2c2   :  { %943 = vlog2.f32 %v649_v5 }
 0x2c8   :  { %v944_v6 = vpop.eup %943 }
 0x2c9   :  { %v653_v7 = vmul.f32 0.6931472, %v944_v6  ;;  %v651_v8 = vpop.xlane.xlu1 %650 }
 0x2ca   :  { %945 = vlog2.f32 %v651_v8 }
 0x2cb   :  { %v656_v9 = vsub.f32 %v642_v62, %v653_v7 }
 0x2cd   :  { %658 = vst [vmem:[#allocation11] sm:$0xff] %v656_v9 }
 0x2d0   :  { %v946_v10 = vpop.eup %945 }
 0x2d1   :  { %v655_v11 = vmul.f32 0.6931472, %v946_v10 }
 0x2d3   :  { %v657_v12 = vsub.f32 %v643_v1, %v655_v11 }
 0x2d5   :  { %659 = vst [vmem:[#allocation11 + $0x8] sm:$0xff] %v657_v12 }
 0x2d6   :  { %663 = vsyncadd [#allocation4], 128  ;;  %s666_s8 = sshll.u32 %s1192_s7, 4  ;;  %s1110_s9 = smov [#allocation11]   ;;  %s667_s8 = int_to_ptr.hbm [resolvable:$true] %s666_s8 }
 0x2d7   :  { %s664_s10 = sshll.u32 %s1110_s9, 4  ;;  %s665_s10 = int_to_ptr.vmem [resolvable:$true] %s664_s10 }
 0x2d8   :  { %672 = dma.vmem_to_hbm [thread:$0]  %s665_s10, 128, %s667_s8, [#allocation4], %s1106_s21, %s1106_s21, %s1107_s22  }
 0x2d9   :  { %1097 = dma.done.wait [#allocation4], 256  }
 0x2da   :  { %1098 = vsyncadd [#allocation4], 4294967040 }
 0x2db   :  { %677 = vsyncpa [#allocation3], 1 }
 0x2dc   :  { %678 = vsyncpa [#allocation6], 1 }
 0x2dd   :  { %679 = vsyncpa [#allocation9], 1 }
 0x2de   :  { %680 = vsyncpa [#allocation4], 1 }

</bundles_post_ra>
